<compile_context>
chip_gen: v7x
topology: tpu7x:2x2x1
jax: 0.10.0
libtpu: 0.0.40
codegen_flags: <defaults>
</compile_context>

<pallas_src>
import jax
import jax.numpy as jnp
from jax.experimental import pallas as pl
from jax.experimental.pallas import tpu as pltpu


def _disc_kernel(hn1_ref, hn2_ref, hp_ref, wc_ref, b_ref, out_ref):
    """Per-(batch, N-tile) bilinear scores.

    hn1_ref, hn2_ref : (1, TN, H1) VMEM
    hp_ref           : (1, Sp, H1) VMEM   Sp in {1, TN}  (compact positive)
    wc_ref           : (1, Sc, H1) VMEM   Sc in {1, TN}  (precomputed h_c @ W^T)
    b_ref            : (1,)        SMEM   bilinear bias
    out_ref          : (1, 3, TN)  VMEM   rows = [sc_p1, sc_n1, sc_n2]
    """
    tn = out_ref.shape[2]
    wc = wc_ref[0].astype(jnp.float32)            # (Sc, H1)
    bias = b_ref[0].astype(jnp.float32)

    def score(x):
        # score[n] = sum_i x[n,i] * wc[n,i] + bias   (VPU mul + XLU lane reduce)
        s = jnp.sum(x.astype(jnp.float32) * wc, axis=-1) + bias   # (Sp|Sc|TN,)
        return jnp.broadcast_to(s, (tn,)).reshape(1, tn)

    # Single lane-dense (3, TN) store per tile.
    out_ref[0] = jnp.concatenate(
        [score(hp_ref[0]), score(hn1_ref[0]), score(hn2_ref[0])], axis=0
    ).astype(out_ref.dtype)


def discriminator_forward(h_c, h_ori, h_p, h_n1, h_n2, weight, bias):
    """JAX wrapper mirroring Discriminator.forward.

    h_ori : (B, N, n_h1)   (only its shape is used, as in PyTorch expand_as)
    h_c   : (B, 1 or N, n_h2)   h_p, h_n1, h_n2 : (B, 1 or N, n_h1)
    weight: (1, n_h1, n_h2)     bias: (1,)
    returns logits: (B, 3*N)
    """
    B, N, H1 = h_ori.shape
    H2 = weight.shape[2]
    W = weight[0]                                          # (H1, H2)

    # Keep side inputs COMPACT along N; only align batch dim (no-op for matching B).
    Sc = h_c.shape[-2]
    Sp = h_p.shape[-2]
    hc = jnp.broadcast_to(h_c, (B, Sc, H2))
    hp = jnp.broadcast_to(h_p, (B, Sp, H1))
    hn1 = jnp.broadcast_to(h_n1, (B, N, H1))
    hn2 = jnp.broadcast_to(h_n2, (B, N, H1))

    # Bilinear reformulation: score = sum(x * (h_c @ W^T), -1) + bias.
    # The only use of W is this tiny contraction on the compact h_c -> kernel is MXU-free.
    wc = jnp.einsum('bsj,ij->bsi', hc, W).astype(hn1.dtype)   # (B, Sc, H1)

    # N-tile: full N when small; otherwise a lane/sublane-friendly tile sized so
    # double-buffered f32 streams stay well inside scoped VMEM (incl. v7x 64 MiB).
    tn = N if N <= 1024 else 512
    grid = (B, pl.cdiv(N, tn))

    def _side_spec(s):
        if s == 1:
            # Same compact block re-used for every N-tile (no HBM broadcast).
            return pl.BlockSpec((1, 1, H1), lambda b, n: (b, 0, 0))
        return pl.BlockSpec((1, tn, H1), lambda b, n: (b, n, 0))

    scores = pl.pallas_call(
        _disc_kernel,
        out_shape=jax.ShapeDtypeStruct((B, 3, N), jnp.float32),
        grid=grid,
        in_specs=[
            pl.BlockSpec((1, tn, H1), lambda b, n: (b, n, 0)),   # h_n1
            pl.BlockSpec((1, tn, H1), lambda b, n: (b, n, 0)),   # h_n2
            _side_spec(Sp),                                      # h_p (compact)
            _side_spec(Sc),                                      # wc  (compact)
            pl.BlockSpec(memory_space=pltpu.SMEM),               # bias scalar
        ],
        out_specs=pl.BlockSpec((1, 3, tn), lambda b, n: (b, 0, n)),
        compiler_params=pltpu.CompilerParams(
            dimension_semantics=("parallel", "parallel")),
    )(hn1, hn2, hp, wc, bias.astype(jnp.float32))

    # (B, 3, N) -> (B, 3N): free contiguous reshape; reproduces torch.cat(dim=1) order.
    return scores.reshape(B, 3 * N)


def _reference_forward(h_c, h_ori, h_p, h_n1, h_n2, weight, bias):
    """Pure-JAX reference of the PyTorch forward (for validation)."""
    B, N, H1 = h_ori.shape
    H2 = weight.shape[2]
    hc = jnp.broadcast_to(h_c, (B, N, H2))
    hp = jnp.broadcast_to(h_p, (B, N, H1))
    hn1 = jnp.broadcast_to(h_n1, (B, N, H1))
    hn2 = jnp.broadcast_to(h_n2, (B, N, H1))
    w = weight[0]

    def bilinear(x1, x2):
        return jnp.einsum("bni,ij,bnj->bn", x1, w, x2) + bias[0]

    sc_p1 = bilinear(hp, hc)
    sc_n1 = bilinear(hn1, hc)
    sc_n2 = bilinear(hn2, hc)
    return jnp.concatenate((sc_p1, sc_n1, sc_n2), axis=1)


if __name__ == "__main__":
    # Small shapes: batch=2, seq(N)=8, hidden n_h1 = n_h2 = 32
    B, N, H = 2, 8, 32
    n_h1 = n_h2 = H

    key = jax.random.PRNGKey(0)
    k_w, k_c, k_ori, k_p, k_n1, k_n2 = jax.random.split(key, 6)

    # Deterministic Bilinear params: xavier_uniform_ on weight (1, n_h1, n_h2), bias = 0
    fan_in = n_h1 * n_h2
    fan_out = 1 * n_h2
    bound = (6.0 / (fan_in + fan_out)) ** 0.5
    weight = jax.random.uniform(
        k_w, (1, n_h1, n_h2), minval=-bound, maxval=bound, dtype=jnp.float32
    )
    bias = jnp.zeros((1,), dtype=jnp.float32)

    # Inputs (feature-last layout, matching nn.Bilinear's (*, features) convention)
    h_ori = jax.random.normal(k_ori, (B, N, n_h1), dtype=jnp.float32)
    h_c = jax.random.normal(k_c, (B, 1, n_h2), dtype=jnp.float32)    # summary, expanded
    h_p = jax.random.normal(k_p, (B, 1, n_h1), dtype=jnp.float32)    # positive, expanded
    h_n1 = jax.random.normal(k_n1, (B, N, n_h1), dtype=jnp.float32)  # negatives
    h_n2 = jax.random.normal(k_n2, (B, N, n_h1), dtype=jnp.float32)

    logits = discriminator_forward(h_c, h_ori, h_p, h_n1, h_n2, weight, bias)
    logits = jax.block_until_ready(logits)

    ref = _reference_forward(h_c, h_ori, h_p, h_n1, h_n2, weight, bias)
    assert logits.shape == (B, 3 * N), logits.shape
    assert jnp.allclose(logits, ref, atol=1e-4, rtol=1e-4), "mismatch vs reference"

    print("KERNEL_OK")
</pallas_src>

<mosaic_0001>
module attributes {stable_mosaic.version = 11 : i64} {
  func.func @_disc_kernel(%arg0: i32, %arg1: i32, %arg2: memref<1x8x32xf32, #tpu.memory_space<vmem>>, %arg3: memref<1x8x32xf32, #tpu.memory_space<vmem>>, %arg4: memref<1x1x32xf32, #tpu.memory_space<vmem>>, %arg5: memref<1x1x32xf32, #tpu.memory_space<vmem>>, %arg6: memref<1xf32, #tpu.memory_space<smem>>, %arg7: memref<1x3x8xf32, #tpu.memory_space<vmem>>) attributes {dimension_semantics = [#tpu.dimension_semantics<parallel>, #tpu.dimension_semantics<parallel>], iteration_bounds = array<i64: 2, 1>, scalar_prefetch = 0 : i64, scratch_operands = 0 : i64, tpu.core_type = #tpu.core_type<tc>, window_params = [{transform_indices = @transform_0, window_bounds = array<i64: 1, 8, 32>}, {transform_indices = @transform_1, window_bounds = array<i64: 1, 8, 32>}, {transform_indices = @transform_2, window_bounds = array<i64: 1, 1, 32>}, {transform_indices = @transform_3, window_bounds = array<i64: 1, 1, 32>}, {transform_indices = @transform_4, window_bounds = array<i64: 1>}, {transform_indices = @transform_5, window_bounds = array<i64: 1, 3, 8>}]} {
    %c0 = arith.constant 0 : index
    %c0_0 = arith.constant 0 : index
    %c0_1 = arith.constant 0 : index
    %0 = vector.load %arg5[%c0, %c0_0, %c0_1] : memref<1x1x32xf32, #tpu.memory_space<vmem>>, vector<1x1x32xf32>
    %1 = vector.shape_cast %0 : vector<1x1x32xf32> to vector<1x32xf32>
    %c0_2 = arith.constant 0 : index
    %2 = memref.load %arg6[%c0_2] : memref<1xf32, #tpu.memory_space<smem>>
    %c0_3 = arith.constant 0 : index
    %c0_4 = arith.constant 0 : index
    %c0_5 = arith.constant 0 : index
    %3 = vector.load %arg4[%c0_3, %c0_4, %c0_5] : memref<1x1x32xf32, #tpu.memory_space<vmem>>, vector<1x1x32xf32>
    %4 = vector.shape_cast %3 : vector<1x1x32xf32> to vector<1x32xf32>
    %5 = arith.mulf %4, %1 : vector<1x32xf32>
    %cst = arith.constant dense<0.000000e+00> : vector<1xf32>
    %6 = vector.multi_reduction <add>, %5, %cst [1] : vector<1x32xf32> to vector<1xf32>
    %7 = vector.broadcast %2 : f32 to vector<1xf32>
    %8 = arith.addf %6, %7 : vector<1xf32>
    %9 = vector.shape_cast %8 : vector<1xf32> to vector<1xf32>
    %10 = vector.broadcast %9 : vector<1xf32> to vector<8xf32>
    %11 = vector.shape_cast %10 : vector<8xf32> to vector<1x8xf32>
    %c0_6 = arith.constant 0 : index
    %c0_7 = arith.constant 0 : index
    %c0_8 = arith.constant 0 : index
    %12 = vector.load %arg2[%c0_6, %c0_7, %c0_8] : memref<1x8x32xf32, #tpu.memory_space<vmem>>, vector<1x8x32xf32>
    %13 = vector.shape_cast %12 : vector<1x8x32xf32> to vector<8x32xf32>
    %14 = vector.broadcast %1 : vector<1x32xf32> to vector<8x32xf32>
    %15 = arith.mulf %13, %14 : vector<8x32xf32>
    %cst_9 = arith.constant dense<0.000000e+00> : vector<8xf32>
    %16 = vector.multi_reduction <add>, %15, %cst_9 [1] : vector<8x32xf32> to vector<8xf32>
    %17 = vector.broadcast %2 : f32 to vector<8xf32>
    %18 = arith.addf %16, %17 : vector<8xf32>
    %19 = vector.shape_cast %18 : vector<8xf32> to vector<1x8xf32>
    %c0_10 = arith.constant 0 : index
    %c0_11 = arith.constant 0 : index
    %c0_12 = arith.constant 0 : index
    %20 = vector.load %arg3[%c0_10, %c0_11, %c0_12] : memref<1x8x32xf32, #tpu.memory_space<vmem>>, vector<1x8x32xf32>
    %21 = vector.shape_cast %20 : vector<1x8x32xf32> to vector<8x32xf32>
    %22 = vector.broadcast %1 : vector<1x32xf32> to vector<8x32xf32>
    %23 = arith.mulf %21, %22 : vector<8x32xf32>
    %cst_13 = arith.constant dense<0.000000e+00> : vector<8xf32>
    %24 = vector.multi_reduction <add>, %23, %cst_13 [1] : vector<8x32xf32> to vector<8xf32>
    %25 = vector.broadcast %2 : f32 to vector<8xf32>
    %26 = arith.addf %24, %25 : vector<8xf32>
    %27 = vector.shape_cast %26 : vector<8xf32> to vector<1x8xf32>
    %28 = tpu.concatenate %11, %19, %27 in 0 : vector<1x8xf32>, vector<1x8xf32>, vector<1x8xf32> -> vector<3x8xf32>
    %c0_14 = arith.constant 0 : index
    %c0_15 = arith.constant 0 : index
    %c0_16 = arith.constant 0 : index
    %29 = vector.load %arg7[%c0_14, %c0_15, %c0_16] : memref<1x3x8xf32, #tpu.memory_space<vmem>>, vector<1x3x8xf32>
    %30 = vector.shape_cast %29 : vector<1x3x8xf32> to vector<3x8xf32>
    %31 = vector.shape_cast %28 : vector<3x8xf32> to vector<1x3x8xf32>
    tpu.vector_store %arg7[%c0_14, %c0_15, %c0_16], %31 {strides = array<i32>} : memref<1x3x8xf32, #tpu.memory_space<vmem>>, vector<1x3x8xf32>,
    return
  }
  func.func @transform_0(%arg0: i32, %arg1: i32) -> (i32, i32, i32) {
    %c0_i32 = arith.constant 0 : i32
    %c0_i32_0 = arith.constant 0 : i32
    return %arg0, %arg1, %c0_i32 : i32, i32, i32
  }
  func.func @transform_1(%arg0: i32, %arg1: i32) -> (i32, i32, i32) {
    %c0_i32 = arith.constant 0 : i32
    %c0_i32_0 = arith.constant 0 : i32
    return %arg0, %arg1, %c0_i32 : i32, i32, i32
  }
  func.func @transform_2(%arg0: i32, %arg1: i32) -> (i32, i32, i32) {
    %c0_i32 = arith.constant 0 : i32
    %c0_i32_0 = arith.constant 0 : i32
    %c0_i32_1 = arith.constant 0 : i32
    return %arg0, %c0_i32, %c0_i32_0 : i32, i32, i32
  }
  func.func @transform_3(%arg0: i32, %arg1: i32) -> (i32, i32, i32) {
    %c0_i32 = arith.constant 0 : i32
    %c0_i32_0 = arith.constant 0 : i32
    %c0_i32_1 = arith.constant 0 : i32
    return %arg0, %c0_i32, %c0_i32_0 : i32, i32, i32
  }
  func.func @transform_4(%arg0: i32, %arg1: i32) -> i32 {
    %c0_i32 = arith.constant 0 : i32
    %c0_i32_0 = arith.constant 0 : i32
    return %c0_i32 : i32
  }
  func.func @transform_5(%arg0: i32, %arg1: i32) -> (i32, i32, i32) {
    %c0_i32 = arith.constant 0 : i32
    %c0_i32_0 = arith.constant 0 : i32
    return %arg0, %c0_i32, %arg1 : i32, i32, i32
  }
}

</mosaic_0001>

<bundles_post_ra>
// kernel: tpu_custom_call.1
= control target key start
LH: loop header
LB: loop body
LE: loop exit
PB: predicated region body
PF: predicated region fallthrough
CT: control target
= control target key end

     0   :  { %s915_s0 = inlined_call_operand.hbm [shape: f32[2,8,32], index: 0, kind: input, shape index: {}]   ;;  %s916_s1 = inlined_call_operand.hbm [shape: f32[2,8,32], index: 1, kind: input, shape index: {}]   ;;  %s917_s2 = inlined_call_operand.vmem [shape: f32[2,1,32], index: 2, kind: input, shape index: {}]   ;;  %s918_s3 = inlined_call_operand.vmem [shape: f32[2,1,32], index: 3, kind: input, shape index: {}]   ;;  %s919_s4 = inlined_call_operand.<no memory space> [shape: f32[1], index: 4, kind: input, shape index: {}]   ;;  %s920_s5 = inlined_call_operand.vmem [shape: f32[2,3,8], index: 5, kind: output, shape index: {}]  }
   0x1   :  { %10 = sst [smem:[#allocation2]] %s919_s4 }
   0x2   :  { %11 = vsyncpa [#allocation4], 0 }
   0x3   :  { %13 = vsyncpa [#allocation4 + $0x1], 0 }
   0x4   :  { %14 = vsyncpa [#allocation6], 0 }
   0x5   :  { %16 = vsyncpa [#allocation6 + $0x1], 0  ;;  %s732_s20 = smov 0   ;;  %s734_s21 = smov 0  }
   0x6   :  { %s736_s22 = smov 0   ;;  %s738_s23 = smov 0  }
   0x7   :  { %s740_s24 = smov 0   ;;  %s742_s25 = smov 0  }
   0x8 LB: > { %s507_s4 = sadd.s32 4294967295, %s695_s25   ;;  %s34_s26 = sadd.s32 1, %s691_s24  ;;  %s695_s25 = sphi %s742_s25, %s22_s25   ;;  %s691_s24 = sphi %s740_s24, %s934_s24   ;;  %s687_s23 = sphi %s738_s23, %s933_s23   ;;  %s683_s22 = sphi %s736_s22, %s932_s22   ;;  %s679_s21 = sphi %s734_s21, %s931_s21   ;;  %s675_s20 = sphi %s732_s20, %s930_s20  }
   0x9   : > { %p36_p0 = scmp.ge.s32.totalorder %s34_s26, 2  ;;  %s43_s27 = sadd.s32 1, %s683_s22 }
   0xa   : > { %p50_p1 = scmp.ne.s32.totalorder %s683_s22, %s679_s21  ;;  %p51_p2 = scmp.eq.s32.totalorder %s695_s25, 0 }
   0xb   : > { %s936_s26 = smov (%p36_p0, %s34_s26), 0  ;;  %p56_p4 = scmp.ne.s32.totalorder %s679_s21, %s675_s20 }
   0xc   : > { %p768_p3 = por %p51_p2, %p50_p1  ;;  %s38_s29 = ssub.s32 %s691_s24, %s936_s26 }
   0xd   : > { %p57_p5 = scmp.eq.s32.totalorder %s507_s4, 0  ;;  %p41_p6 = scmp.eq.s32.totalorder %s38_s29, 0 }
   0xe   : > { %p532_p8 = scmp.lt.s32.totalorder %s695_s25, 2  ;;  %s784_s7 = sand.u32 1, %s683_s22  }
   0xf   : > { %p775_p7 = por %p57_p5, %p56_p4  ;;  %s512_s8 = sshll.u32 %s691_s24, 7 }
  0x10   : > { %s781_s6 = scalar_select %p41_p6, %s683_s22, %s43_s27  }
  0x11   : > { %s923_s30 = scalar_select %p775_p7, 1, 0 }
  0x12   : > { %s511_s9 = sshll.u32 %s784_s7, 3  ;;  %s793_s12 = scalar_lea.hbm %s915_s0, %s512_s8 }
  0x13   : > { %s216_s13 = scalar_lea.vmem [#allocation3], %s511_s9  ;;  %p799_p9 = pnand %p532_p8, %p768_p3 }
  0x14   : > { %s224_s14 = sshll.u32 %s216_s13, 4  ;;  %s213_s16 = scalar_lea.sflag [#allocation4], %s784_s7  ;;  %s803_s14 = int_to_ptr.vmem [resolvable:$true] %s224_s14 }
  0x15   : > { %s581_s17 = scalar_lea.hbm %s793_s12, 128  ;;  %p583_p13 = pneg %p799_p9 }
  0x16   : > { %p582_p12 = scmp.ne.s32.totalorder %s793_s12, %s581_s17  ;;  %s586_s20 = scalar_lea.hbm %s915_s0, 256 }
  0x17   : > { %p587_p2 = scmp.lt.u32.totalorder %s793_s12, %s915_s0  ;;  %p588_p3 = scmp.lt.u32.totalorder %s586_s20, %s581_s17 }
  0x18   : > { %p584_p0 = pnand %p583_p13, %p582_p12  ;;  %p590_p5 = scmp.lt.u32.totalorder %s581_s17, %s793_s12 }
  0x19   : > { %p589_p4 = por %p588_p3, %p587_p2 }
  0x1a   : > { %p585_p1 = pneg %p584_p0 }
  0x1b   : > { %p591_p6 = por %p590_p5, %p589_p4 }
  0x1d   : > { %p592_p8 = pnand %p591_p6, %p585_p1 }
  0x1f   : > { %595 = shalt.err (!%p592_p8)
}
  0x20   : > { %s596_s28 = scalar_lea.vmem %s803_s14, 128  ;;  %s697_s29 = smov [#allocation3]  }
  0x21   : > { %p597_p12 = scmp.ne.s32.totalorder %s803_s14, %s596_s28  ;;  %s601_s10 = sshll.u32 %s697_s29, 4  ;;  %s602_s10 = int_to_ptr.vmem [resolvable:$false] %s601_s10 }
  0x22   : > { %s603_s11 = scalar_lea.vmem %s602_s10, 256  ;;  %p604_p11 = scmp.lt.s32.totalorder %s803_s14, %s602_s10 }
  0x23   : > { %p599_p0 = pnand %p597_p12, %p583_p13  ;;  %p605_p2 = scmp.lt.s32.totalorder %s603_s11, %s596_s28 }
  0x25   : > { %p600_p10 = pneg %p599_p0  ;;  %p606_p3 = por %p605_p2, %p604_p11 }
  0x27   : > { %p607_p4 = pnand %p606_p3, %p600_p10 }
  0x29   : > { %610 = shalt.err (!%p607_p4)
}
  0x2a   : > { %528 = dma.hbm_to_vmem [thread:$0]  (!%p799_p9), %s793_s12, 128, %s803_s14, %s213_s16  }
  0x2b   : > { %p925_p1 = scmp.lt.s32.totalorder %s695_s25, 3  ;;  %p926_p5 = scmp.ge.s32.totalorder %s695_s25, 1 }
  0x2c   : > { %s846_s19 = scalar_lea.hbm %s916_s1, %s512_s8  ;;  %s235_s20 = scalar_lea.vmem [#allocation5], %s511_s9 }
  0x2d   : > { %p837_p6 = pnand %p926_p5, %p925_p1  ;;  %s243_s4 = sshll.u32 %s235_s20, 4  ;;  %s244_s4 = int_to_ptr.vmem [resolvable:$true] %s243_s4 }
  0x2e   : > { %s232_s12 = scalar_lea.sflag [#allocation6], %s784_s7  ;;  %s611_s14 = scalar_lea.hbm %s846_s19, 128 }
  0x2f   : > { %s927_s13 = scalar_select %p837_p6, 1, 0 }
  0x30   : > { %p612_p10 = scmp.ne.s32.totalorder %s846_s19, %s611_s14  ;;  %s616_s8 = scalar_lea.hbm %s916_s1, 256 }
  0x31   : > { %p617_p12 = scmp.lt.u32.totalorder %s846_s19, %s916_s1  ;;  %p618_p0 = scmp.lt.u32.totalorder %s616_s8, %s611_s14 }
  0x32   : > { %p614_p11 = pnand %p612_p10, %p583_p13  ;;  %p620_p3 = scmp.lt.u32.totalorder %s611_s14, %s846_s19 }
  0x33   : > { %p619_p2 = por %p618_p0, %p617_p12 }
  0x34   : > { %p615_p8 = pneg %p614_p11 }
  0x35   : > { %p621_p4 = por %p620_p3, %p619_p2 }
  0x37   : > { %p622_p1 = pnand %p621_p4, %p615_p8 }
  0x39   : > { %625 = shalt.err (!%p622_p1)
}
  0x3a   : > { %s626_s7 = scalar_lea.vmem %s244_s4, 128  ;;  %s698_s9 = smov [#allocation5]  }
  0x3b   : > { %p627_p5 = scmp.ne.s32.totalorder %s244_s4, %s626_s7  ;;  %s631_s10 = sshll.u32 %s698_s9, 4  ;;  %s632_s10 = int_to_ptr.vmem [resolvable:$false] %s631_s10 }
  0x3c   : > { %s633_s11 = scalar_lea.vmem %s632_s10, 256  ;;  %p634_p7 = scmp.lt.s32.totalorder %s244_s4, %s632_s10 }
  0x3d   : > { %p629_p10 = pnand %p627_p5, %p583_p13  ;;  %p635_p6 = scmp.lt.s32.totalorder %s633_s11, %s626_s7 }
  0x3f   : > { %p630_p11 = pneg %p629_p10  ;;  %p636_p0 = por %p635_p6, %p634_p7 }
  0x41   : > { %p637_p12 = pnand %p636_p0, %p630_p11 }
  0x43   : > { %640 = shalt.err (!%p637_p12)
}
  0x44   : > { %531 = dma.hbm_to_vmem [thread:$0]  (!%p799_p9), %s846_s19, 128, %s244_s4, %s232_s12  }
  0x45   : > { %p928_p8 = scmp.ne.s32.totalorder %s927_s13, 0 }
  0x46   : > { %s266_s17 = sand.u32 (!%p928_p8), 1, %s679_s21   ;;  %p929_p13 = scmp.ne.s32.totalorder (!%p928_p8), %s923_s30, 0 }
  0x47   : > { %264 = sbr.rel (%p928_p8) target bundleno = 244 (0xf4), region = 40  ;;  %s516_s18 = sshll.u32 (!%p928_p8), %s266_s17, 3 }
  0x48   : > { %s267_s20 = scalar_lea.sflag (!%p928_p8), [#allocation4], %s266_s17  ;;  %s270_s14 = scalar_lea.vmem (!%p928_p8), [#allocation3], %s516_s18 }
  0x4e   : > { %666 = dma.done.wait (%p929_p13), %s267_s20, 128  }
  0x4f   : > { %668 = vsyncadd (%p929_p13), %s267_s20, 4294967168  ;;  %s276_s16 = scalar_lea.sflag [#allocation6], %s266_s17  ;;  %s279_s27 = scalar_lea.vmem [#allocation5], %s516_s18 }
  0x50   : > { %670 = dma.done.wait (%p929_p13), %s276_s16, 128  }
  0x51   : > { %672 = vsyncadd (%p929_p13), %s276_s16, 4294967168  ;;  %p319_p7 = scmp.lt.s32.totalorder %s687_s23, 1  ;;  %v344_v0 = vlaneseq  ;;  %v342_v6 = vld [vmem:[%s270_s14] sm:$0xff]  ;;  %vm336_vm0 = vcmask 253952   ;;  %v355_v10 = vld [vmem:[%s279_s27] sm:$0xff]  ;;  %vm350_vm1 = vcmask 261120  }
  0x52   : > { %s333_s8 = sld [smem:[#allocation2]]  ;;  %vm375_vm2 = vcmask 1040384   ;;  %vm377_vm3 = vcmask 1041408   ;;  %vm379_vm4 = vcmask 59392  }
  0x53   : > { %s938_s23 = smov (!%p319_p7, %s687_s23), 1  ;;  %v345_v1 = vshrl.u32 %v344_v0, 7  ;;  %v363_v2 = vand.u32 127, %v344_v0 }
  0x54   : > { %s324_s19 = scalar_lea.vmem %s918_s3, %s938_s23  ;;  %s321_s30 = scalar_lea.vmem %s917_s2, %s938_s23 }
  0x55   : > { %v346_v3 = vsub.s32 0, %v345_v1  ;;  %v366_v4 = vsub.s32 %v363_v2, %v345_v1  ;;  %v332_v5 = vld [vmem:[%s324_s19] sm:$0x1]  ;;  %s518_s28 = sshll.u32 %s938_s23, 2 }
  0x56   : > { %v334_v7 = vld [vmem:[%s321_s30] sm:$0x1]  ;;  %s331_s9 = scalar_lea.vmem %s920_s5, %s518_s28 }
  0x57   : > { %v347_v8 = vrot.slane %v332_v5, %v346_v3  ;;  %v335_v9 = vmul.f32 %v334_v7, %v332_v5 }
  0x58   : > { %v340_v16 = vstv %s333_s8 }
  0x59   : > { %v349_v11 = vmul.f32 %v347_v8, %v342_v6  ;;  %v337_v12 = vsel %vm336_vm0, %v335_v9, 0.0  ;;  %v356_v13 = vmul.f32 %v355_v10, %v347_v8 }
  0x5a   : > { %338 = vadd.xlane.f32.xlu1 %v337_v12 }
  0x5b   : > { %v351_v14 = vsel %vm350_vm1, %v349_v11, 0.0  ;;  %v357_v15 = vsel %vm350_vm1, %v356_v13, 0.0 }
  0x5c   : > { %352 = vadd.xlane.f32.xlu0 %v351_v14 }
  0x60   : > { %358 = vadd.xlane.f32.xlu0 %v357_v15 }
  0xe7   : > { %v339_v19 = vpop.xlane.xlu1 %338 }
  0xe8   : > { %v341_v21 = vadd.f32 %v340_v16, %v339_v19 }
  0xe9   : > { %v353_v17 = vpop.xlane.xlu0 %352 }
  0xea   : > { %v354_v18 = vadd.f32 %v353_v17, %v340_v16 }
  0xec   : > { %v367_v20 = vrot.slane %v354_v18, %v366_v4 }
  0xed   : > { %v359_v22 = vpop.xlane.xlu0 %358 }
  0xee   : > { %v360_v23 = vadd.f32 %v359_v22, %v340_v16  ;;  %v376_v25 = vsel %vm375_vm2, %v341_v21, %v367_v20 }
  0xf0   : > { %v373_v24 = vrot.slane %v360_v23, %v366_v4 }
  0xf2   : > { %v378_v26 = vsel %vm377_vm3, %v376_v25, %v373_v24 }
  0xf3   : > { %380 = vst.msk [vmem:[%s331_s9] sm:$0x7] %vm379_vm4, %v378_v26 }
  0xf4 PF: > { %s22_s25 = sadd.s32 1, %s695_s25   ;;  %s930_s20 = smov %s679_s21 }
  0xf5   : > { %p19_p9 = scmp.ge.s32.totalorder %s22_s25, 4   ;;  %s931_s21 = smov %s683_s22 }
  0xf6   : > { %s932_s22 = smov %s781_s6  ;;  %s933_s23 = smov %s691_s24 }
  0xf7   : > { %s934_s24 = smov %s936_s26  ;;  %21 = sbr.rel (!%p19_p9) target bundleno = 8 (0x8), region = 99 }
  0xfe   :  { %406 = vsyncpa [#allocation4], 1 }
  0xff   :  { %408 = vsyncpa [#allocation4 + $0x1], 1 }
 0x100   :  { %409 = vsyncpa [#allocation6], 1 }
 0x101   :  { %411 = vsyncpa [#allocation6 + $0x1], 1 }

</bundles_post_ra>
